<compile_context>
chip_gen: v5e
topology: v5e:2x2
jax: 0.10.0
libtpu: 0.0.40
codegen_flags: <defaults>
</compile_context>

<pallas_src>
import jax
import jax.numpy as jnp
from jax.experimental import pallas as pl
from jax.experimental.pallas import tpu as pltpu

_LANES = 1024                    # multiple of 128 -> unmasked vld/vst
_TILE_ROWS_MAX = 512             # 512*1024*4B = 2 MiB per buffer (v7x-safe)
_PALLAS_MIN_ELEMENTS = 1 << 20   # below this, fused XLA sigmoid wins


def _round_up(x: int, m: int) -> int:
    return ((x + m - 1) // m) * m


def _sigmoid_kernel(x_ref, o_ref):
    # Elementwise sigmoid. exp issues on the EUP slot; the kernel is purely
    # HBM-bandwidth-bound so the exact divide (vs approx reciprocal) is free
    # and keeps bit-level parity with the reference.
    x = x_ref[...]
    # f32 compute: mandatory on v5e (no bf16 VPU/EUP); no-op for f32 inputs.
    xf = x.astype(jnp.float32)
    y = 1.0 / (1.0 + jnp.exp(-xf))
    o_ref[...] = y.astype(o_ref.dtype)


@jax.jit
def _sigmoid_pallas_flat(x_flat: jax.Array) -> jax.Array:
    """Sigmoid over a flat vector via a lane-dense, tiled Pallas kernel."""
    total = x_flat.shape[0]

    rows = pl.cdiv(total, _LANES)
    tile_rows = min(_TILE_ROWS_MAX, _round_up(rows, 8))   # (8,128)-aligned
    rows_padded = _round_up(rows, tile_rows)
    padded_total = rows_padded * _LANES

    xp = jnp.pad(x_flat, (0, padded_total - total))       # pad tail with 0s
    x2d = xp.reshape(rows_padded, _LANES)                 # lane-dense slab

    out2d = pl.pallas_call(
        _sigmoid_kernel,
        out_shape=jax.ShapeDtypeStruct(x2d.shape, x_flat.dtype),
        grid=(rows_padded // tile_rows,),
        in_specs=[pl.BlockSpec((tile_rows, _LANES), lambda i: (i, 0))],
        out_specs=pl.BlockSpec((tile_rows, _LANES), lambda i: (i, 0)),
        # Independent row tiles -> shard across TensorCores on v7x.
        compiler_params=pltpu.CompilerParams(
            dimension_semantics=("parallel",)),
        # Pure elementwise overwrite: reuse the padded input's HBM buffer.
        input_output_aliases={0: 0},
    )(x2d)

    return out2d.reshape(-1)[:total]


def heino_forward(ipt: jax.Array) -> jax.Array:
    """Pallas implementation of Heino.forward (sigmoid), NCHW in/out."""
    if ipt.size < _PALLAS_MIN_ELEMENTS:
        # Launch + per-grid-step overhead dwarfs the work for tiny inputs;
        # let XLA emit a fused elementwise sigmoid instead.
        return jax.nn.sigmoid(ipt)
    return _sigmoid_pallas_flat(ipt.reshape(-1)).reshape(ipt.shape)


if __name__ == "__main__":
    key = jax.random.PRNGKey(0)
    k_small, k_big = jax.random.split(key)

    # Mirror the original script: ipt = reshape(ipt, (-1, 1, 2, 2))
    ipt_small = jax.random.normal(
        k_small, (2 * 1 * 2 * 2,), dtype=jnp.float32).reshape(-1, 1, 2, 2)

    # Exercise the Pallas kernel directly on the tiny module-shaped input.
    out_small = _sigmoid_pallas_flat(ipt_small.reshape(-1)).reshape(
        ipt_small.shape)
    out_small = jax.block_until_ready(out_small)
    ref_small = jax.nn.sigmoid(ipt_small)
    assert out_small.shape == ipt_small.shape
    assert out_small.dtype == ipt_small.dtype
    assert jnp.allclose(out_small, ref_small, atol=1e-6)

    # Also exercise multiple grid steps + ragged-tail padding/unpadding.
    ipt_big = jax.random.normal(
        k_big, (150000 * 1 * 2 * 2,), dtype=jnp.float32).reshape(-1, 1, 2, 2)
    out_big = jax.block_until_ready(
        _sigmoid_pallas_flat(ipt_big.reshape(-1)).reshape(ipt_big.shape))
    ref_big = jax.nn.sigmoid(ipt_big)
    assert jnp.allclose(out_big, ref_big, atol=1e-6)

    # Public entry point (routes tiny inputs to the fused XLA path).
    out_fwd = jax.block_until_ready(heino_forward(ipt_small))
    assert jnp.allclose(out_fwd, ref_small, atol=1e-6)

    print("KERNEL_OK")
</pallas_src>

<mosaic_0001>
module attributes {stable_mosaic.version = 11 : i64} {
  func.func @_sigmoid_kernel(%arg0: i32, %arg1: memref<8x1024xf32, #tpu.memory_space<vmem>>, %arg2: memref<8x1024xf32, #tpu.memory_space<vmem>>) attributes {dimension_semantics = [#tpu.dimension_semantics<parallel>], iteration_bounds = array<i64: 1>, scalar_prefetch = 0 : i64, scratch_operands = 0 : i64, tpu.core_type = #tpu.core_type<tc>, window_params = [{transform_indices = @transform_0, window_bounds = array<i64: 8, 1024>}, {transform_indices = @transform_1, window_bounds = array<i64: 8, 1024>}]} {
    %c0 = arith.constant 0 : index
    %c0_0 = arith.constant 0 : index
    %0 = vector.load %arg1[%c0, %c0_0] : memref<8x1024xf32, #tpu.memory_space<vmem>>, vector<8x1024xf32>
    %cst = arith.constant 0.000000e+00 : f32
    %1 = vector.broadcast %cst : f32 to vector<8x1024xf32>
    %2 = arith.subf %1, %0 : vector<8x1024xf32>
    %3 = math.exp %2 : vector<8x1024xf32>
    %cst_1 = arith.constant 1.000000e+00 : f32
    %4 = vector.broadcast %cst_1 : f32 to vector<8x1024xf32>
    %5 = arith.addf %4, %3 : vector<8x1024xf32>
    %cst_2 = arith.constant 1.000000e+00 : f32
    %6 = vector.broadcast %cst_2 : f32 to vector<8x1024xf32>
    %7 = arith.divf %6, %5 : vector<8x1024xf32>
    %c0_3 = arith.constant 0 : index
    %c0_4 = arith.constant 0 : index
    %8 = vector.load %arg2[%c0_3, %c0_4] : memref<8x1024xf32, #tpu.memory_space<vmem>>, vector<8x1024xf32>
    tpu.vector_store %arg2[%c0_3, %c0_4], %7 {strides = array<i32>} : memref<8x1024xf32, #tpu.memory_space<vmem>>, vector<8x1024xf32>,
    return
  }
  func.func @transform_0(%arg0: i32) -> (i32, i32) {
    %c0_i32 = arith.constant 0 : i32
    %c0_i32_0 = arith.constant 0 : i32
    return %arg0, %c0_i32 : i32, i32
  }
  func.func @transform_1(%arg0: i32) -> (i32, i32) {
    %c0_i32 = arith.constant 0 : i32
    %c0_i32_0 = arith.constant 0 : i32
    return %arg0, %c0_i32 : i32, i32
  }
}

</mosaic_0001>

<bundles_post_ra>
// kernel: _sigmoid_pallas_flat.1
= control target key start
LH: loop header
LB: loop body
LE: loop exit
PB: predicated region body
PF: predicated region fallthrough
CT: control target
= control target key end

     0   :  { %s375_s0 = inlined_call_operand.vmem [shape: f32[8,1024], index: 0, kind: input, shape index: {}, may-alias: {0,1}]   ;;  %s376_s1 = inlined_call_operand.vmem [shape: f32[8,1024], index: 1, kind: output, shape index: {}, may-alias: {0,1}]  }
   0x1   :  { %v8_v0 = vld [vmem:[%s375_s0] sm:$0xff]  ;;  %v9_v1 = vld [vmem:[%s375_s0 + $0x8] sm:$0xff]  ;;  %v10_v2 = vld [vmem:[%s375_s0 + $0x10] sm:$0xff] }
   0x2   :  { %v16_v3 = vsub.f32 0.0, %v8_v0  ;;  %v17_v4 = vsub.f32 0.0, %v9_v1  ;;  %v18_v5 = vsub.f32 0.0, %v10_v2  ;;  %v11_v6 = vld [vmem:[%s375_s0 + $0x18] sm:$0xff]  ;;  %v12_v7 = vld [vmem:[%s375_s0 + $0x20] sm:$0xff]  ;;  %v13_v8 = vld [vmem:[%s375_s0 + $0x28] sm:$0xff] }
   0x3   :  { %v19_v9 = vsub.f32 0.0, %v11_v6  ;;  %v20_v10 = vsub.f32 0.0, %v12_v7  ;;  %v21_v11 = vsub.f32 0.0, %v13_v8  ;;  %v14_v17 = vld [vmem:[%s375_s0 + $0x30] sm:$0xff]  ;;  %v15_v19 = vld [vmem:[%s375_s0 + $0x38] sm:$0xff] }
   0x4   :  { %v24_v12 = vmul.f32 1.442695, %v16_v3  ;;  %v26_v13 = vmul.f32 1.442695, %v17_v4  ;;  %v28_v14 = vmul.f32 1.442695, %v18_v5 }
   0x5   :  { %v30_v15 = vmul.f32 1.442695, %v19_v9  ;;  %v32_v16 = vmul.f32 1.442695, %v20_v10  ;;  %v34_v18 = vmul.f32 1.442695, %v21_v11 }
   0x6   :  { %180 = vpow2.f32 %v24_v12  ;;  %v22_v20 = vsub.f32 0.0, %v14_v17  ;;  %v23_v21 = vsub.f32 0.0, %v15_v19 }
   0x7   :  { %182 = vpow2.f32 %v26_v13 }
   0x8   :  { %184 = vpow2.f32 %v28_v14  ;;  %v36_v25 = vmul.f32 1.442695, %v22_v20  ;;  %v38_v28 = vmul.f32 1.442695, %v23_v21 }
   0x9   :  { %186 = vpow2.f32 %v30_v15 }
   0xa   :  { %188 = vpow2.f32 %v32_v16 }
   0xb   :  { %190 = vpow2.f32 %v34_v18 }
   0xc   :  { %v181_v22 = vpop.eup %180 }
   0xd   :  { %v183_v23 = vpop.eup %182  ;;  %v40_v24 = vadd.f32 1.0, %v181_v22 }
   0xe   :  { %v185_v26 = vpop.eup %184  ;;  %v246_v27 = vadd.f32 1.0, %v183_v23 }
   0xf   :  { %v187_v29 = vpop.eup %186  ;;  %192 = vrcp.f32 %v40_v24  ;;  %v57_v31 = vand.u32 2147483647, %v40_v24  ;;  %v59_v33 = vand.u32 2147483648, %v40_v24  ;;  %v249_v34 = vadd.f32 1.0, %v185_v26 }
  0x10   :  { %v189_v30 = vpop.eup %188  ;;  %194 = vrcp.f32 %v246_v27  ;;  %v251_v35 = vadd.f32 1.0, %v187_v29  ;;  %v72_v36 = vand.u32 2147483647, %v246_v27  ;;  %v74_v37 = vand.u32 2147483648, %v246_v27 }
  0x11   :  { %v191_v32 = vpop.eup %190  ;;  %196 = vpow2.f32 %v36_v25  ;;  %v255_v38 = vadd.f32 1.0, %v189_v30  ;;  %vm53_vm0 = vweird.f32 %v40_v24  ;;  %vm68_vm1 = vweird.f32 %v246_v27 }
  0x12   :  { %198 = vpow2.f32 %v38_v28  ;;  %v89_v39 = vand.u32 2147483648, %v249_v34  ;;  %vm260_vm2 = vcmp.eq.f32.partialorder %v57_v31, 8.507059e+37  ;;  %v87_v41 = vand.u32 2147483647, %v249_v34 }
  0x13   :  { %200 = vrcp.f32 %v249_v34  ;;  %v266_v42 = vadd.f32 1.0, %v191_v32  ;;  %v60_v44 = vor.u32 1.1754944e-38, %v59_v33  ;;  %v102_v45 = vand.u32 2147483647, %v251_v35 }
  0x14   :  { %202 = vrcp.f32 %v251_v35  ;;  %v104_v46 = vand.u32 2147483648, %v251_v35  ;;  %vm271_vm3 = vcmp.eq.f32.partialorder %v72_v36, 8.507059e+37  ;;  %v75_v50 = vor.u32 1.1754944e-38, %v74_v37 }
  0x15   :  { %v193_v43 = vpop.eup %192  ;;  %204 = vrcp.f32 %v255_v38  ;;  %vm83_vm4 = vweird.f32 %v249_v34  ;;  %v90_v53 = vor.u32 1.1754944e-38, %v89_v39  ;;  %vm98_vm5 = vweird.f32 %v251_v35 }
  0x16   :  { %v195_v47 = vpop.eup %194  ;;  %v49_v48 = vmul.f32 %v193_v43, %v40_v24  ;;  %v119_v54 = vand.u32 2147483648, %v255_v38  ;;  %vm54_vm6 = vweird.f32 %v193_v43  ;;  %vm279_vm7 = vcmp.eq.f32.partialorder %v87_v41, 8.507059e+37 }
  0x17   :  { %v197_v51 = vpop.eup %196  ;;  %v64_v52 = vmul.f32 %v195_v47, %v246_v27  ;;  %vm113_vm8 = vweird.f32 %v255_v38  ;;  %206 = vrcp.f32 %v266_v42  ;;  %vm69_vm9 = vweird.f32 %v195_v47  ;;  %vm295_vm12 = vmor %vm53_vm0, %vm54_vm6 }
  0x18   :  { %v199_v55 = vpop.eup %198  ;;  %v50_v56 = vsub.f32 1.0, %v49_v48  ;;  %vm285_vm10 = vcmp.eq.f32.partialorder %v102_v45, 8.507059e+37  ;;  %v105_v61 = vor.u32 1.1754944e-38, %v104_v46  ;;  %v117_v62 = vand.u32 2147483647, %v255_v38  ;;  %vm303_vm14 = vmor %vm68_vm1, %vm69_vm9 }
  0x19   :  { %v201_v58 = vpop.eup %200  ;;  %v65_v59 = vsub.f32 1.0, %v64_v52  ;;  %vm128_vm11 = vweird.f32 %v266_v42  ;;  %v132_v2 = vand.u32 2147483647, %v266_v42  ;;  %v120_v7 = vor.u32 1.1754944e-38, %v119_v54 }
  0x1a   :  { %v203_v63 = vpop.eup %202  ;;  %v51_v0 = vmul.f32 %v193_v43, %v50_v56  ;;  %v79_v1 = vmul.f32 %v201_v58, %v249_v34  ;;  %vm84_vm13 = vweird.f32 %v201_v58  ;;  %v46_v14 = vadd.f32 1.0, %v197_v51 }
  0x1b   :  { %v205_v3 = vpop.eup %204  ;;  %v66_v5 = vmul.f32 %v195_v47, %v65_v59  ;;  %v94_v6 = vmul.f32 %v203_v63, %v251_v35  ;;  %vm99_vm15 = vweird.f32 %v203_v63  ;;  %v47_v19 = vadd.f32 1.0, %v199_v55  ;;  %vm317_vm1 = vmor %vm83_vm4, %vm84_vm13 }
  0x1c   :  { %v52_v8 = vadd.f32 %v193_v43, %v51_v0  ;;  %v80_v10 = vsub.f32 1.0, %v79_v1  ;;  %v109_v11 = vmul.f32 %v205_v3, %v255_v38  ;;  %vm114_vm0 = vweird.f32 %v205_v3 }
  0x1d   :  { %v67_v12 = vadd.f32 %v195_v47, %v66_v5  ;;  %v95_v13 = vsub.f32 1.0, %v94_v6  ;;  %v207_v15 = vpop.eup %206  ;;  %v134_v29 = vand.u32 2147483648, %v266_v42  ;;  %208 = vrcp.f32 %v46_v14 }
  0x1e   :  { %v56_v16 = vsel %vm295_vm12, %v193_v43, %v52_v8  ;;  %v81_v17 = vmul.f32 %v201_v58, %v80_v10  ;;  %v110_v18 = vsub.f32 1.0, %v109_v11  ;;  %v124_v24 = vmul.f32 %v207_v15, %v266_v42 }
  0x1f   :  { %v61_v20 = vsel %vm260_vm2, %v60_v44, %v56_v16  ;;  %v71_v21 = vsel %vm303_vm14, %v195_v47, %v67_v12  ;;  %v96_v23 = vmul.f32 %v203_v63, %v95_v13  ;;  %vm330_vm2 = vmor %vm98_vm5, %vm99_vm15  ;;  %vm129_vm4 = vweird.f32 %v207_v15 }
  0x20   :  { %168 = vst [vmem:[%s376_s1] sm:$0xff] %v61_v20  ;;  %v76_v25 = vsel %vm271_vm3, %v75_v50, %v71_v21  ;;  %v82_v26 = vadd.f32 %v201_v58, %v81_v17  ;;  %v111_v28 = vmul.f32 %v205_v3, %v110_v18  ;;  %vm341_vm3 = vmor %vm113_vm8, %vm114_vm0  ;;  %v125_v32 = vsub.f32 1.0, %v124_v24 }
  0x21   :  { %169 = vst [vmem:[%s376_s1 + $0x8] sm:$0xff] %v76_v25  ;;  %v97_v30 = vadd.f32 %v203_v63, %v96_v23  ;;  %vm118_vm5 = vcmp.eq.f32.partialorder %v117_v62, 8.507059e+37  ;;  %210 = vrcp.f32 %v47_v19  ;;  %vm130_vm6 = vmor %vm128_vm11, %vm129_vm4  ;;  %v135_v40 = vor.u32 1.1754944e-38, %v134_v29 }
  0x22   :  { %v86_v33 = vsel %vm317_vm1, %v201_v58, %v82_v26  ;;  %v112_v34 = vadd.f32 %v205_v3, %v111_v28  ;;  %v126_v37 = vmul.f32 %v207_v15, %v125_v32  ;;  %vm143_vm8 = vweird.f32 %v46_v14 }
  0x23   :  { %v91_v35 = vsel %vm279_vm7, %v90_v53, %v86_v33  ;;  %v101_v36 = vsel %vm330_vm2, %v203_v63, %v97_v30  ;;  %vm133_vm7 = vcmp.eq.f32.partialorder %v132_v2, 8.507059e+37  ;;  %v209_v44 = vpop.eup %208  ;;  %v149_v42 = vand.u32 2147483648, %v46_v14 }
  0x24   :  { %170 = vst [vmem:[%s376_s1 + $0x10] sm:$0xff] %v91_v35  ;;  %v106_v38 = vsel %vm285_vm10, %v105_v61, %v101_v36  ;;  %v116_v39 = vsel %vm341_vm3, %v205_v3, %v112_v34  ;;  %v127_v43 = vadd.f32 %v207_v15, %v126_v37  ;;  %v139_v47 = vmul.f32 %v209_v44, %v46_v14 }
  0x25   :  { %171 = vst [vmem:[%s376_s1 + $0x18] sm:$0xff] %v106_v38  ;;  %v121_v41 = vsel %vm118_vm5, %v120_v7, %v116_v39  ;;  %vm144_vm9 = vweird.f32 %v209_v44  ;;  %v147_v50 = vand.u32 2147483647, %v46_v14  ;;  %vm158_vm10 = vweird.f32 %v47_v19 }
  0x26   :  { %172 = vst [vmem:[%s376_s1 + $0x20] sm:$0xff] %v121_v41  ;;  %v131_v45 = vsel %vm130_vm6, %v207_v15, %v127_v43  ;;  %v140_v49 = vsub.f32 1.0, %v139_v47  ;;  %v164_v52 = vand.u32 2147483648, %v47_v19  ;;  %v162_v55 = vand.u32 2147483647, %v47_v19  ;;  %vm145_vm12 = vmor %vm143_vm8, %vm144_vm9 }
  0x27   :  { %v136_v46 = vsel %vm133_vm7, %v135_v40, %v131_v45  ;;  %v211_v48 = vpop.eup %210  ;;  %v150_v56 = vor.u32 1.1754944e-38, %v149_v42  ;;  %vm148_vm13 = vcmp.eq.f32.partialorder %v147_v50, 8.507059e+37 }
  0x28   :  { %173 = vst [vmem:[%s376_s1 + $0x28] sm:$0xff] %v136_v46  ;;  %v154_v51 = vmul.f32 %v211_v48, %v47_v19  ;;  %v141_v53 = vmul.f32 %v209_v44, %v140_v49  ;;  %vm159_vm11 = vweird.f32 %v211_v48  ;;  %v165_v59 = vor.u32 1.1754944e-38, %v164_v52 }
  0x29   :  { %vm160_vm14 = vmor %vm158_vm10, %vm159_vm11  ;;  %vm163_vm15 = vcmp.eq.f32.partialorder %v162_v55, 8.507059e+37 }
  0x2a   :  { %v155_v54 = vsub.f32 1.0, %v154_v51  ;;  %v142_v57 = vadd.f32 %v209_v44, %v141_v53 }
  0x2c   :  { %v156_v58 = vmul.f32 %v211_v48, %v155_v54  ;;  %v146_v60 = vsel %vm145_vm12, %v209_v44, %v142_v57 }
  0x2d   :  { %v151_v62 = vsel %vm148_vm13, %v150_v56, %v146_v60 }
  0x2e   :  { %v157_v61 = vadd.f32 %v211_v48, %v156_v58  ;;  %174 = vst [vmem:[%s376_s1 + $0x30] sm:$0xff] %v151_v62 }
  0x30   :  { %v161_v63 = vsel %vm160_vm14, %v211_v48, %v157_v61 }
  0x31   :  { %v166_v0 = vsel %vm163_vm15, %v165_v59, %v161_v63 }
  0x32   :  { %175 = vst [vmem:[%s376_s1 + $0x38] sm:$0xff] %v166_v0 }

</bundles_post_ra>
